<compile_context>
chip_gen: v6e
topology: v6e:2x2x1
jax: 0.10.0
libtpu: 0.0.40
codegen_flags: <defaults>
</compile_context>

<pallas_src>
import functools

import numpy as np
import jax
import jax.numpy as jnp
from jax import lax
from jax.experimental import pallas as pl
from jax.experimental.pallas import tpu as pltpu


# ----------------------------- parameter setup ------------------------------

def _hz_to_mel(f):
    return 2595.0 * np.log10(1.0 + f / 700.0)


def _mel_to_hz(m):
    return 700.0 * (10.0 ** (m / 2595.0) - 1.0)


def _round_up(x, m):
    return ((x + m - 1) // m) * m


def _mel_filterbank(n_mels, n_fft, sample_rate):
    """Triangular (HTK-style) mel filterbank, shape (n_fft//2+1, n_mels)."""
    n_freqs = n_fft // 2 + 1
    fft_freqs = np.arange(n_freqs) * sample_rate / n_fft
    mel_pts = np.linspace(_hz_to_mel(0.0), _hz_to_mel(sample_rate / 2.0), n_mels + 2)
    hz_pts = _mel_to_hz(mel_pts)
    fb = np.zeros((n_freqs, n_mels), np.float32)
    for m in range(n_mels):
        lo, c, hi = hz_pts[m], hz_pts[m + 1], hz_pts[m + 2]
        up = (fft_freqs - lo) / max(c - lo, 1e-8)
        dn = (hi - fft_freqs) / max(hi - c, 1e-8)
        fb[:, m] = np.maximum(0.0, np.minimum(up, dn))
    return fb


def _make_transform_mats(mel_scales, n_fft, sample_rate, phases_per_row):
    """Phase-grouped windowed DFT matrix (cos|sin fused) + mel filterbank.

    With P = phases_per_row hop-phases packed per waveform row (row width
    K = P*hop) and Q = 4 // P phase blocks:

      w_all:  (K, Q * Np) bf16, Np = 2 * n_freq_pad.  Column block p holds the
              window*cos / window*sin rows for frame-sample indices
              n = p*K + r, so   frame @ [cos|sin] == sum_p rows[f + p*P] @ W_p.
      fb_pad: (n_freq_pad, n_mels_pad) f32, concatenated mel banks, zero-padded
              to 128 lanes on both axes (padded cols contribute exactly 0 to
              the loss since both signals give log(eps) there).
    """
    n_freqs = n_fft // 2 + 1
    # NOTE: Nyquist bin kept (could fold it to shave padding — see review),
    # to preserve exact reference semantics.
    n_freq_pad = _round_up(max(n_freqs, 128), 128)
    k_width = phases_per_row * (n_fft // 4)
    n_phase_blocks = 4 // phases_per_row

    window = 0.5 - 0.5 * np.cos(2.0 * np.pi * np.arange(n_fft) / n_fft)  # periodic Hann
    n = np.arange(n_fft, dtype=np.float64)[:, None]
    k = np.arange(n_freq_pad, dtype=np.float64)[None, :]
    ang = 2.0 * np.pi * n * k / n_fft
    cos_m = (np.cos(ang) * window[:, None]).astype(np.float32)
    sin_m = (np.sin(ang) * window[:, None]).astype(np.float32)
    cos_m[:, n_freqs:] = 0.0
    sin_m[:, n_freqs:] = 0.0

    np2 = 2 * n_freq_pad
    cossin = np.concatenate([cos_m, sin_m], axis=1)           # (n_fft, 2*n_freq_pad)
    # frame sample index n = p*K + r  ->  row r, column block p
    w_all = (cossin.reshape(n_phase_blocks, k_width, np2)
             .transpose(1, 0, 2).reshape(k_width, n_phase_blocks * np2))

    fbs = [_mel_filterbank(m, n_fft, sample_rate) for m in mel_scales]
    fb = np.concatenate(fbs, axis=1)                          # (n_freqs, sum(mel_scales))
    n_mels_pad = _round_up(max(fb.shape[1], 128), 128)
    fb_pad = np.zeros((n_freq_pad, n_mels_pad), np.float32)
    fb_pad[:n_freqs, :fb.shape[1]] = fb

    return (jnp.asarray(w_all, dtype=jnp.bfloat16),
            jnp.asarray(fb_pad, dtype=jnp.float32),
            n_freq_pad, n_mels_pad)


# --------------------------------- kernel -----------------------------------

def _mel_loss_kernel(eps, n_frames, f_tile, n_freq_pad, n_phase_blocks,
                     phases_per_row, has_remainder,
                     yt_ref, yp_ref, w_ref, fb_ref, out_ref):
    """Per-mel-column partial sums of squared log-mel diffs for one (b, tile).

    yt_ref / yp_ref : (G, K) bf16 hop-strided waveform rows (K = P*hop)
    w_ref           : (K, Q*Np) bf16 phase-grouped windowed DFT matrix
    fb_ref          : (n_freq_pad, n_mels_pad) f32 concatenated mel filterbanks
    out_ref         : (1, 1, n_mels_pad) f32 partial sums (frame axis reduced)
    """
    j = pl.program_id(1)
    f0 = pl.multiple_of(j * f_tile, f_tile)       # first frame of this tile
    np2 = 2 * n_freq_pad

    def log_mel(y_ref):
        # Accumulating phase matmuls: acc[f] = sum_p rows[f + p*P] @ W_p.
        acc = jnp.dot(y_ref[pl.ds(f0, f_tile), :], w_ref[:, 0:np2],
                      preferred_element_type=jnp.float32)       # (f_tile, 2*Np)
        for p in range(1, n_phase_blocks):
            start = pl.multiple_of(f0 + p * phases_per_row, phases_per_row)
            acc = acc + jnp.dot(y_ref[pl.ds(start, f_tile), :],
                                w_ref[:, p * np2:(p + 1) * np2],
                                preferred_element_type=jnp.float32)
        re = acc[:, :n_freq_pad]
        im = acc[:, n_freq_pad:]
        power = re * re + im * im                               # (f_tile, n_freq_pad) f32
        mel = jnp.dot(power, fb_ref[...],
                      preferred_element_type=jnp.float32)       # (f_tile, n_mels_pad) f32
        return jnp.log(mel + eps)

    d = log_mel(yt_ref) - log_mel(yp_ref)                       # (f_tile, n_mels_pad)
    dsq = d * d
    # Padded mel columns are exactly 0 (log(eps) - log(eps)); only frame rows
    # beyond n_frames (last-tile remainder) need masking.
    if has_remainder:
        last = pl.num_programs(1) - 1

        @pl.when(j != last)
        def _():
            out_ref[...] = jnp.sum(dsq, axis=0)[None, None, :]

        @pl.when(j == last)
        def _():
            rows = lax.broadcasted_iota(jnp.int32, dsq.shape, 0) + j * f_tile
            masked = jnp.where(rows < n_frames, dsq, 0.0)
            out_ref[...] = jnp.sum(masked, axis=0)[None, None, :]
    else:
        out_ref[...] = jnp.sum(dsq, axis=0)[None, None, :]


# -------------------------------- wrapper ------------------------------------

def mel_loss(y_true, y_pred, *, mel_scales=(16, 32, 64), n_fft=512,
             sample_rate=44100, eps=1e-07, frame_tile=1024, phases_per_row=None):
    """Multi-scale mel RMSE loss (scalar), mirroring MelLoss.forward.

    frame_tile: frames processed per grid step (rounded to a multiple of 8).
    phases_per_row: hop-phases packed per waveform row (1, 2 or 4).  Default:
      2 when hop >= 128 (K = 2*hop, 256-deep MXU feed on v6e/v7x),
      4 when hop < 128 (full frames, no in-kernel phase recombination).
    """
    y_true = jnp.asarray(y_true, jnp.float32)
    y_pred = jnp.asarray(y_pred, jnp.float32)
    assert y_true.shape == y_pred.shape and y_true.ndim == 2
    B, T = y_true.shape
    assert n_fft % 4 == 0 and T >= n_fft
    hop = n_fft // 4
    n_frames = 1 + (T - n_fft) // hop
    n_mels_total = int(sum(mel_scales))

    if phases_per_row is None:
        phases_per_row = 2 if hop >= 128 else 4
    assert phases_per_row in (1, 2, 4)
    n_phase_blocks = 4 // phases_per_row
    k_width = phases_per_row * hop

    w_all, fb_pad, n_freq_pad, n_mels_pad = _make_transform_mats(
        mel_scales, n_fft, sample_rate, phases_per_row)

    f_tile = min(_round_up(n_frames, 8), _round_up(int(frame_tile), 8))
    nf = pl.cdiv(n_frames, f_tile)
    has_remainder = (nf * f_tile) != n_frames
    # Rows needed: all tiled frames plus the phase lookahead rows.
    g_rows = _round_up(nf * f_tile + (n_phase_blocks - 1) * phases_per_row, 8)
    t_need = (g_rows - 1) * hop + k_width

    def to_rows(y):
        # Hop-strided rows: rows[g, r] = y[g*hop + r], row width K = P*hop
        # (P-fold bf16 duplication; HBM intensity stays deeply compute-bound).
        if t_need > T:
            y = jnp.pad(y, ((0, 0), (0, t_need - T)))
        idx = jnp.arange(g_rows)[:, None] * hop + jnp.arange(k_width)[None, :]
        return y[:, idx].astype(jnp.bfloat16)                  # (B, g_rows, K)

    rows_t = to_rows(y_true)
    rows_p = to_rows(y_pred)

    kernel = functools.partial(
        _mel_loss_kernel, float(eps), int(n_frames), int(f_tile),
        int(n_freq_pad), int(n_phase_blocks), int(phases_per_row),
        bool(has_remainder))

    np2 = 2 * n_freq_pad
    partial_sums = pl.pallas_call(
        kernel,
        out_shape=jax.ShapeDtypeStruct((B, nf, n_mels_pad), jnp.float32),
        grid_spec=pltpu.PrefetchScalarGridSpec(
            num_scalar_prefetch=0,
            grid=(B, nf),
            in_specs=[
                pl.BlockSpec((None, g_rows, k_width), lambda b, j: (b, 0, 0)),
                pl.BlockSpec((None, g_rows, k_width), lambda b, j: (b, 0, 0)),
                # Constant operands: no benefit from double-buffering.
                pl.BlockSpec((k_width, n_phase_blocks * np2),
                             lambda b, j: (0, 0),
                             pipeline_mode=pl.Buffered(1)),
                pl.BlockSpec((n_freq_pad, n_mels_pad),
                             lambda b, j: (0, 0),
                             pipeline_mode=pl.Buffered(1)),
            ],
            out_specs=pl.BlockSpec((1, 1, n_mels_pad), lambda b, j: (b, j, 0)),
        ),
        compiler_params=pltpu.CompilerParams(
            dimension_semantics=("parallel", "parallel"),
            vmem_limit_bytes=64 * 1024 * 1024),
    )(rows_t, rows_p, w_all, fb_pad)

    # RMSE per batch element over the whole perceptual vector, then mean.
    count = n_frames * n_mels_total
    per_batch = jnp.sum(partial_sums, axis=(1, 2))
    distances = jnp.sqrt(per_batch / count + eps)
    return distances.mean()


# ---------------------------------- main -------------------------------------

if __name__ == "__main__":
    key = jax.random.PRNGKey(0)
    k1, k2 = jax.random.split(key)
    B, T = 2, 512
    y_true = jax.random.uniform(k1, (B, T), dtype=jnp.float32)
    y_pred = jax.random.uniform(k2, (B, T), dtype=jnp.float32)

    loss = mel_loss(y_true, y_pred, mel_scales=(8, 16, 32), n_fft=128,
                    sample_rate=44100, eps=1e-7)
    loss = jax.block_until_ready(loss)
    assert loss.shape == () and bool(jnp.isfinite(loss))
    print("KERNEL_OK")
</pallas_src>

<mosaic_0001>
module attributes {stable_mosaic.version = 11 : i64} {
  func.func @_mel_loss_kernel(%arg0: i32, %arg1: i32, %arg2: memref<1x16x128xbf16, #tpu.memory_space<vmem>>, %arg3: memref<1x16x128xbf16, #tpu.memory_space<vmem>>, %arg4: memref<128x256xbf16, #tpu.memory_space<vmem>>, %arg5: memref<128x128xf32, #tpu.memory_space<vmem>>, %arg6: memref<1x1x128xf32, #tpu.memory_space<vmem>>) attributes {dimension_semantics = [#tpu.dimension_semantics<parallel>, #tpu.dimension_semantics<parallel>], iteration_bounds = array<i64: 2, 1>, scalar_prefetch = 0 : i64, scratch_operands = 0 : i64, tpu.core_type = #tpu.core_type<tc>, window_params = [{transform_indices = @transform_0, window_bounds = array<i64: 1, 16, 128>}, {transform_indices = @transform_1, window_bounds = array<i64: 1, 16, 128>}, {pipeline_mode = #tpu.pipeline_mode<synchronous>, transform_indices = @transform_2, window_bounds = array<i64: 128, 256>}, {pipeline_mode = #tpu.pipeline_mode<synchronous>, transform_indices = @transform_3, window_bounds = array<i64: 128, 128>}, {transform_indices = @transform_4, window_bounds = array<i64: 1, 1, 128>}]} {
    %c16_i32 = arith.constant 16 : i32
    %0 = arith.muli %arg1, %c16_i32 : i32
    %1 = tpu.assume_multiple %0, 16 : i32
    %c0 = arith.constant 0 : index
    %2 = arith.index_cast %1 : i32 to index
    %c0_0 = arith.constant 0 : index
    %3 = vector.load %arg2[%c0, %2, %c0_0] : memref<1x16x128xbf16, #tpu.memory_space<vmem>>, vector<1x16x128xbf16>
    %4 = vector.shape_cast %3 : vector<1x16x128xbf16> to vector<16x128xbf16>
    %c0_1 = arith.constant 0 : index
    %c0_2 = arith.constant 0 : index
    %5 = vector.load %arg4[%c0_1, %c0_2] : memref<128x256xbf16, #tpu.memory_space<vmem>>, vector<128x256xbf16>
    %cst = arith.constant dense<0.000000e+00> : vector<16x256xf32>
    %6 = tpu.matmul %4, %5, %cst {dimension_numbers = #tpu.dot_dimension_numbers<[1], [0], [0], [1], [0, 0, 1, 1], [], []>} : vector<16x128xbf16>, vector<128x256xbf16>, vector<16x256xf32> -> vector<16x256xf32>
    %7 = vector.extract_strided_slice %6 {offsets = [0, 0], sizes = [16, 128], strides = [1, 1]} : vector<16x256xf32> to vector<16x128xf32>
    %8 = vector.extract_strided_slice %6 {offsets = [0, 128], sizes = [16, 128], strides = [1, 1]} : vector<16x256xf32> to vector<16x128xf32>
    %9 = arith.mulf %7, %7 : vector<16x128xf32>
    %10 = arith.mulf %8, %8 : vector<16x128xf32>
    %11 = arith.addf %9, %10 : vector<16x128xf32>
    %c0_3 = arith.constant 0 : index
    %c0_4 = arith.constant 0 : index
    %12 = vector.load %arg5[%c0_3, %c0_4] : memref<128x128xf32, #tpu.memory_space<vmem>>, vector<128x128xf32>
    %cst_5 = arith.constant dense<0.000000e+00> : vector<16x128xf32>
    %13 = tpu.matmul %11, %12, %cst_5 {dimension_numbers = #tpu.dot_dimension_numbers<[1], [0], [0], [1], [0, 0, 1, 1], [], []>} : vector<16x128xf32>, vector<128x128xf32>, vector<16x128xf32> -> vector<16x128xf32>
    %cst_6 = arith.constant 1.000000e-07 : f32
    %14 = vector.broadcast %cst_6 : f32 to vector<16x128xf32>
    %15 = arith.addf %13, %14 : vector<16x128xf32>
    %16 = math.log %15 : vector<16x128xf32>
    %c0_7 = arith.constant 0 : index
    %17 = arith.index_cast %1 : i32 to index
    %c0_8 = arith.constant 0 : index
    %18 = vector.load %arg3[%c0_7, %17, %c0_8] : memref<1x16x128xbf16, #tpu.memory_space<vmem>>, vector<1x16x128xbf16>
    %19 = vector.shape_cast %18 : vector<1x16x128xbf16> to vector<16x128xbf16>
    %c0_9 = arith.constant 0 : index
    %c0_10 = arith.constant 0 : index
    %20 = vector.load %arg4[%c0_9, %c0_10] : memref<128x256xbf16, #tpu.memory_space<vmem>>, vector<128x256xbf16>
    %cst_11 = arith.constant dense<0.000000e+00> : vector<16x256xf32>
    %21 = tpu.matmul %19, %20, %cst_11 {dimension_numbers = #tpu.dot_dimension_numbers<[1], [0], [0], [1], [0, 0, 1, 1], [], []>} : vector<16x128xbf16>, vector<128x256xbf16>, vector<16x256xf32> -> vector<16x256xf32>
    %22 = vector.extract_strided_slice %21 {offsets = [0, 0], sizes = [16, 128], strides = [1, 1]} : vector<16x256xf32> to vector<16x128xf32>
    %23 = vector.extract_strided_slice %21 {offsets = [0, 128], sizes = [16, 128], strides = [1, 1]} : vector<16x256xf32> to vector<16x128xf32>
    %24 = arith.mulf %22, %22 : vector<16x128xf32>
    %25 = arith.mulf %23, %23 : vector<16x128xf32>
    %26 = arith.addf %24, %25 : vector<16x128xf32>
    %c0_12 = arith.constant 0 : index
    %c0_13 = arith.constant 0 : index
    %27 = vector.load %arg5[%c0_12, %c0_13] : memref<128x128xf32, #tpu.memory_space<vmem>>, vector<128x128xf32>
    %cst_14 = arith.constant dense<0.000000e+00> : vector<16x128xf32>
    %28 = tpu.matmul %26, %27, %cst_14 {dimension_numbers = #tpu.dot_dimension_numbers<[1], [0], [0], [1], [0, 0, 1, 1], [], []>} : vector<16x128xf32>, vector<128x128xf32>, vector<16x128xf32> -> vector<16x128xf32>
    %cst_15 = arith.constant 1.000000e-07 : f32
    %29 = vector.broadcast %cst_15 : f32 to vector<16x128xf32>
    %30 = arith.addf %28, %29 : vector<16x128xf32>
    %31 = math.log %30 : vector<16x128xf32>
    %32 = arith.subf %16, %31 : vector<16x128xf32>
    %33 = arith.mulf %32, %32 : vector<16x128xf32>
    %c0_i32 = arith.constant 0 : i32
    %34 = arith.cmpi ne, %arg1, %c0_i32 : i32
    %35 = arith.extui %34 : i1 to i32
    %c0_i32_16 = arith.constant 0 : i32
    %36 = arith.cmpi ne, %35, %c0_i32_16 : i32
    scf.if %36 {
      %cst_19 = arith.constant dense<0.000000e+00> : vector<128xf32>
      %40 = vector.multi_reduction <add>, %33, %cst_19 [0] : vector<16x128xf32> to vector<128xf32>
      %41 = vector.shape_cast %40 : vector<128xf32> to vector<1x1x128xf32>
      %c0_20 = arith.constant 0 : index
      %c0_21 = arith.constant 0 : index
      %c0_22 = arith.constant 0 : index
      %42 = vector.load %arg6[%c0_20, %c0_21, %c0_22] : memref<1x1x128xf32, #tpu.memory_space<vmem>>, vector<1x1x128xf32>
      tpu.vector_store %arg6[%c0_20, %c0_21, %c0_22], %41 {strides = array<i32>} : memref<1x1x128xf32, #tpu.memory_space<vmem>>, vector<1x1x128xf32>,
    } else {
    }
    %c0_i32_17 = arith.constant 0 : i32
    %37 = arith.cmpi eq, %arg1, %c0_i32_17 : i32
    %38 = arith.extui %37 : i1 to i32
    %c0_i32_18 = arith.constant 0 : i32
    %39 = arith.cmpi ne, %38, %c0_i32_18 : i32
    scf.if %39 {
      %40 = tpu.iota {dimensions = array<i32: 0>} : vector<16x128xi32>
      %c16_i32_19 = arith.constant 16 : i32
      %41 = arith.muli %arg1, %c16_i32_19 : i32
      %42 = vector.broadcast %41 : i32 to vector<16x128xi32>
      %43 = arith.addi %40, %42 : vector<16x128xi32>
      %c13_i32 = arith.constant 13 : i32
      %44 = vector.broadcast %c13_i32 : i32 to vector<16x128xi32>
      %45 = arith.cmpi slt, %43, %44 : vector<16x128xi32>
      %cst_20 = arith.constant 0.000000e+00 : f32
      %46 = vector.broadcast %cst_20 : f32 to vector<16x128xf32>
      %47 = arith.select %45, %33, %46 : vector<16x128xi1>, vector<16x128xf32>
      %cst_21 = arith.constant dense<0.000000e+00> : vector<128xf32>
      %48 = vector.multi_reduction <add>, %47, %cst_21 [0] : vector<16x128xf32> to vector<128xf32>
      %49 = vector.shape_cast %48 : vector<128xf32> to vector<1x1x128xf32>
      %c0_22 = arith.constant 0 : index
      %c0_23 = arith.constant 0 : index
      %c0_24 = arith.constant 0 : index
      %50 = vector.load %arg6[%c0_22, %c0_23, %c0_24] : memref<1x1x128xf32, #tpu.memory_space<vmem>>, vector<1x1x128xf32>
      tpu.vector_store %arg6[%c0_22, %c0_23, %c0_24], %49 {strides = array<i32>} : memref<1x1x128xf32, #tpu.memory_space<vmem>>, vector<1x1x128xf32>,
    } else {
    }
    return
  }
  func.func @transform_0(%arg0: i32, %arg1: i32) -> (i32, i32, i32) {
    %c0_i32 = arith.constant 0 : i32
    %c0_i32_0 = arith.constant 0 : i32
    %c0_i32_1 = arith.constant 0 : i32
    return %arg0, %c0_i32, %c0_i32_0 : i32, i32, i32
  }
  func.func @transform_1(%arg0: i32, %arg1: i32) -> (i32, i32, i32) {
    %c0_i32 = arith.constant 0 : i32
    %c0_i32_0 = arith.constant 0 : i32
    %c0_i32_1 = arith.constant 0 : i32
    return %arg0, %c0_i32, %c0_i32_0 : i32, i32, i32
  }
  func.func @transform_2(%arg0: i32, %arg1: i32) -> (i32, i32) {
    %c0_i32 = arith.constant 0 : i32
    %c0_i32_0 = arith.constant 0 : i32
    %c0_i32_1 = arith.constant 0 : i32
    return %c0_i32, %c0_i32_0 : i32, i32
  }
  func.func @transform_3(%arg0: i32, %arg1: i32) -> (i32, i32) {
    %c0_i32 = arith.constant 0 : i32
    %c0_i32_0 = arith.constant 0 : i32
    %c0_i32_1 = arith.constant 0 : i32
    return %c0_i32, %c0_i32_0 : i32, i32
  }
  func.func @transform_4(%arg0: i32, %arg1: i32) -> (i32, i32, i32) {
    %c0_i32 = arith.constant 0 : i32
    %c0_i32_0 = arith.constant 0 : i32
    return %arg0, %arg1, %c0_i32 : i32, i32, i32
  }
}

</mosaic_0001>

<bundles_post_ra>
// kernel: tpu_custom_call.1
= control target key start
LH: loop header
LB: loop body
LE: loop exit
PB: predicated region body
PF: predicated region fallthrough
CT: control target
= control target key end

     0   :  { %s1667_s0 = inlined_call_operand.hbm [shape: bf16[2,16,128], index: 0, kind: input, shape index: {}]   ;;  %s1668_s1 = inlined_call_operand.hbm [shape: bf16[2,16,128], index: 1, kind: input, shape index: {}]   ;;  %s1669_s2 = inlined_call_operand.hbm [shape: bf16[128,256], index: 2, kind: input, shape index: {}]   ;;  %s1670_s3 = inlined_call_operand.hbm [shape: f32[128,128], index: 3, kind: input, shape index: {}]   ;;  %s1671_s4 = inlined_call_operand.hbm [shape: f32[2,1,128], index: 4, kind: output, shape index: {}]  }
   0x1   :  { %1674 = sst [smem:[#allocation18_spill]] %s1667_s0 }
   0x2   :  { %1675 = sst [smem:[#allocation19_spill]] %s1669_s2 }
   0x3   :  { %1676 = sst [smem:[#allocation20_spill]] %s1670_s3 }
   0x4   :  { %9 = vsyncpa [#allocation3], 0 }
   0x5   :  { %11 = vsyncpa [#allocation3 + $0x1], 0 }
   0x6   :  { %12 = vsyncpa [#allocation6], 0 }
   0x7   :  { %14 = vsyncpa [#allocation6 + $0x1], 0 }
   0x8   :  { %15 = vsyncpa [#allocation9], 0 }
   0x9   :  { %16 = vsyncpa [#allocation4], 0 }
   0xa   :  { %18 = vsyncpa [#allocation4 + $0x1], 0  ;;  %s1373_s15 = smov 0   ;;  %s1375_s16 = smov 0  }
   0xb   :  { %s1377_s17 = smov 0   ;;  %s1379_s18 = smov 0  }
   0xc   :  { %s1381_s19 = smov 0   ;;  %s1383_s20 = smov 0  }
   0xd LB: > { %s1404_s21 = sadd.s32 4294967295, %s1336_s20   ;;  %s864_s22 = sadd.s32 4294967294, %s1336_s20   ;;  %s1336_s20 = sphi %s1383_s20, %s24_s20   ;;  %s1332_s19 = sphi %s1381_s19, %s1701_s19   ;;  %s1328_s18 = sphi %s1379_s18, %s1700_s18   ;;  %s1324_s17 = sphi %s1377_s17, %s1699_s17   ;;  %s1320_s16 = sphi %s1375_s16, %s1698_s16   ;;  %s1316_s15 = sphi %s1373_s15, %s1697_s15  }
   0xe   : > { %p56_p0 = scmp.ne.s32.totalorder %s1320_s16, %s1316_s15  ;;  %p1672_p1 = scmp.eq.s32.totalorder %s1404_s21, 0 }
   0xf   : > { %p156_p3 = scmp.eq.s32.totalorder %s864_s22, 1  ;;  %p865_p5 = scmp.ge.s32.totalorder %s1336_s20, 1 }
  0x10   : > { %p1413_p4 = por %p1672_p1, %p56_p0  ;;  %p163_p7 = scmp.lt.s32.totalorder %s1336_s20, 3 }
  0x11   : > { %p1418_p6 = por %p156_p3, %p56_p0  ;;  %s1338_s26 = smov [#allocation7]  }
  0x12   : > { %p1423_p8 = pnand %p865_p5, %p163_p7  ;;  %s175_s27 = sshll.u32 %s1338_s26, 4  ;;  %s176_s27 = int_to_ptr.vmem [resolvable:$true] %s175_s27 }
  0x13   : > { %s1678_s24 = scalar_select %p1418_p6, 1, 0 }
  0x14   : > { %p1023_p9 = pneg %p1423_p8  ;;  %s1339_s29 = smov [#allocation8]  }
  0x15   : > { %s188_s30 = sshll.u32 %s1339_s29, 4  ;;  %s1147_s5 = scalar_lea.vmem %s176_s27, 2048  ;;  %s189_s30 = int_to_ptr.vmem [resolvable:$true] %s188_s30 }
  0x16   : > { %p1432_p11 = pnand %p1023_p9, %p1672_p1  ;;  %p1148_p13 = scmp.ne.s32.totalorder %s176_s27, %s1147_s5 }
  0x17   : > { %p1155_p5 = scmp.lt.s32.totalorder %s176_s27, %s176_s27  ;;  %p1156_p7 = scmp.lt.s32.totalorder %s1147_s5, %s1147_s5 }
  0x18   : > { %p1138_p12 = pneg %p1432_p11 }
  0x19   : > { %p1157_p10 = por %p1156_p7, %p1155_p5 }
  0x1a   : > { %p1150_p0 = pnand %p1148_p13, %p1138_p12 }
  0x1c   : > { %p1151_p3 = pneg %p1150_p0 }
  0x1e   : > { %p1158_p9 = pnand %p1157_p10, %p1151_p3 }
  0x20   : > { %1161 = shalt.err (!%p1158_p9)
}
  0x21   : > { %s1340_s6 = smov 128   ;;  %s1341_s7 = smov 8  }
  0x22   : > { %s1681_s2 = sld [smem:[#allocation19_spill]]  ;;  %s1173_s10 = scalar_lea.vmem %s189_s30, 2048 }
  0x23   : > { %p1174_p1 = scmp.ne.s32.totalorder %s189_s30, %s1173_s10  ;;  %p1181_p2 = scmp.lt.s32.totalorder %s189_s30, %s189_s30 }
  0x24   : > { %p1182_p6 = scmp.lt.s32.totalorder %s1173_s10, %s1173_s10 }
  0x25   : > { %p1176_p13 = pnand %p1174_p1, %p1138_p12 }
  0x26   : > { %p1183_p5 = por %p1182_p6, %p1181_p2 }
  0x27   : > { %p1177_p0 = pneg %p1176_p13 }
  0x28   : > { %1026 = dma.hbm_to_vmem [thread:$0]  (!%p1432_p11), %s1681_s2, 2048, %s176_s27, [#allocation6], %s1340_s6, %s1340_s6, %s1341_s7  }
  0x29   : > { %p1184_p10 = pnand %p1183_p5, %p1177_p0 }
  0x2b   : > { %1187 = shalt.err (!%p1184_p10)
}
  0x2c   : > { %s1682_s3 = sld [smem:[#allocation20_spill]]  ;;  %s36_s13 = sadd.s32 1, %s1332_s19 }
  0x2d   : > { %s43_s14 = sadd.s32 1, %s1324_s17  ;;  %p38_p1 = scmp.ge.s32.totalorder %s36_s13, 2 }
  0x2e   : > { %p50_p2 = scmp.ne.s32.totalorder %s1324_s17, %s1320_s16  ;;  %p51_p6 = scmp.eq.s32.totalorder %s1336_s20, 0 }
  0x2f   : > { %p1043_p12 = scmp.lt.s32.totalorder %s1336_s20, 2  ;;  %s1703_s13 = smov (%p38_p1, %s36_s13), 0 }
  0x30   : > { %1683 = sst [smem:[#allocation16_spill]] %s1703_s13  ;;  %p52_p3 = por %p51_p6, %p50_p2 }
  0x31   : > { %p1684_p7 = scmp.eq.s32.totalorder %s1404_s21, 1  ;;  %s40_s26 = ssub.s32 %s1332_s19, %s1703_s13 }
  0x32   : > { %1029 = dma.hbm_to_vmem [thread:$0]  (!%p1432_p11), %s1682_s3, 2048, %s189_s30, [#allocation9], %s1340_s6, %s1340_s6, %s1341_s7  }
  0x33   : > { %p1464_p9 = por %p1684_p7, %p50_p2  ;;  %s202_s27 = sand.u32 1, %s1324_s17  }
  0x34   : > { %p41_p11 = scmp.eq.s32.totalorder %s40_s26, 0  ;;  %s1471_s28 = sshll.u32 %s202_s27, 3 }
  0x35   : > { %s901_s29 = sshll.u32 %s1332_s19, 7  ;;  %s1687_s0 = sld [smem:[#allocation18_spill]] }
  0x36   : > { %s1475_s30 = scalar_select %p41_p11, %s1324_s17, %s43_s14  }
  0x37   : > { %s206_s8 = scalar_lea.vmem [#allocation2], %s1471_s28  ;;  %p1485_p13 = pnand %p1043_p12, %p52_p3 }
  0x38   : > { %1686 = sst [smem:[#allocation17_spill]] %s1475_s30  ;;  %s213_s9 = sshll.u32 %s206_s8, 4  ;;  %s214_s9 = int_to_ptr.vmem [resolvable:$true] %s213_s9 }
  0x39   : > { %s203_s11 = scalar_lea.sflag [#allocation3], %s202_s27  ;;  %p1190_p0 = pneg %p1485_p13 }
  0x3a   : > { %s1201_s12 = scalar_lea.vmem %s214_s9, 128  ;;  %s1342_s14 = smov [#allocation2]  }
  0x3b   : > { %s212_s7 = scalar_lea.hbm %s1687_s0, %s901_s29  ;;  %p1202_p5 = scmp.ne.s32.totalorder %s214_s9, %s1201_s12 }
  0x3c   : > { %s1206_s26 = sshll.u32 %s1342_s14, 4  ;;  %s1207_s26 = int_to_ptr.vmem [resolvable:$false] %s1206_s26 }
  0x3d   : > { %p1204_p10 = pnand %p1202_p5, %p1190_p0  ;;  %s1208_s5 = scalar_lea.vmem %s1207_s26, 256 }
  0x3e   : > { %p1209_p2 = scmp.lt.s32.totalorder %s214_s9, %s1207_s26  ;;  %p1210_p6 = scmp.lt.s32.totalorder %s1208_s5, %s1201_s12 }
  0x3f   : > { %p1205_p1 = pneg %p1204_p10 }
  0x40   : > { %p1211_p12 = por %p1210_p6, %p1209_p2 }
  0x42   : > { %p1212_p3 = pnand %p1211_p12, %p1205_p1 }
  0x44   : > { %1215 = shalt.err (!%p1212_p3)
}
  0x45   : > { %s1343_s6 = smov 64   ;;  %s1344_s27 = smov 4  }
  0x46   : > { %1033 = dma.hbm_to_vmem [thread:$0]  (!%p1485_p13), %s212_s7, 128, %s214_s9, %s203_s11, %s1343_s6, %s1343_s6, %s1344_s27  }
  0x47   : > { %s233_s14 = scalar_lea.hbm %s1668_s1, %s901_s29  ;;  %s227_s2 = scalar_lea.vmem [#allocation5], %s1471_s28 }
  0x48   : > { %s234_s26 = sshll.u32 %s227_s2, 4  ;;  %s223_s12 = sand.u32 1, %s1336_s20   ;;  %s235_s26 = int_to_ptr.vmem [resolvable:$true] %s234_s26 }
  0x49   : > { %s224_s5 = scalar_lea.sflag [#allocation6], %s223_s12  ;;  %s1229_s3 = scalar_lea.vmem %s235_s26, 128 }
  0x4a   : > { %p1230_p7 = scmp.ne.s32.totalorder %s235_s26, %s1229_s3  ;;  %s1345_s13 = smov [#allocation5]  }
  0x4b   : > { %s1234_s30 = sshll.u32 %s1345_s13, 4  ;;  %s1235_s30 = int_to_ptr.vmem [resolvable:$false] %s1234_s30 }
  0x4c   : > { %p1232_p11 = pnand %p1230_p7, %p1190_p0  ;;  %s1236_s7 = scalar_lea.vmem %s1235_s30, 256 }
  0x4d   : > { %p1237_p10 = scmp.lt.s32.totalorder %s235_s26, %s1235_s30  ;;  %p1238_p1 = scmp.lt.s32.totalorder %s1236_s7, %s1229_s3 }
  0x4e   : > { %p1233_p5 = pneg %p1232_p11 }
  0x4f   : > { %p1239_p2 = por %p1238_p1, %p1237_p10 }
  0x51   : > { %p1240_p6 = pnand %p1239_p2, %p1233_p5 }
  0x53   : > { %1243 = shalt.err (!%p1240_p6)
}
  0x54   : > { %1036 = dma.hbm_to_vmem [thread:$0]  (!%p1485_p13), %s233_s14, 128, %s235_s26, %s224_s5, %s1343_s6, %s1343_s6, %s1344_s27  }
  0x55   : > { %246 = sbr.rel (%p1423_p8) target bundleno = 612 (0x264), region = 36  ;;  %s1511_s0 = sand.u32 (!%p1423_p8), 1, %s1320_s16  }
  0x56   : > { %s876_s2 = sshll.u32 (!%p1423_p8), %s1511_s0, 3  ;;  %s249_s13 = scalar_lea.sflag (!%p1423_p8), [#allocation3], %s1511_s0 }
  0x57   : > { %s1515_s28 = scalar_lea.vmem (!%p1423_p8), [#allocation2], %s876_s2 }
  0x5a   : > { %1295 = dma.done.wait (%p1413_p4), %s249_s13, 128  }
  0x5b   : > { %1297 = vsyncadd (%p1413_p4), %s249_s13, 4294967168  ;;  %s257_s3 = sand.u32 1, %s1404_s21   ;;  %s1522_s29 = scalar_lea.vmem [#allocation5], %s876_s2 }
  0x5c   : > { %s258_s25 = scalar_lea.sflag [#allocation6], %s257_s3 }
  0x5d   : > { %1299 = dma.done.wait (%p1413_p4), %s258_s25, 128  }
  0x5e   : > { %1301 = vsyncadd (%p1413_p4), %s258_s25, 4294967168  ;;  %p1689_p8 = scmp.eq.s32.totalorder %s1404_s21, 0 }
  0x60   : > { %1303 = dma.done.wait (%p1689_p8), [#allocation6], 2048   ;;  %p1690_p13 = pmov %p1689_p8 }
  0x61   : > { %p1691_p0 = pmov %p1689_p8 }
  0x62   : > { %1305 = vsyncadd (%p1690_p13), [#allocation6], 4294965248 }
  0x63   : > { %1307 = dma.done.wait (%p1691_p0), [#allocation9], 2048   ;;  %p1692_p12 = pmov %p1691_p0 }
  0x64   : > { %v1346_v0 = vmov 0   ;;  %v1102_v1 = vld [vmem:[#allocation7 + $0x74] ss:$8 sps:$4 sm:$0xff]   ;;  %v1537_v2 = vld [vmem:[#allocation7 + $0x70] ss:$8 sps:$4 sm:$0xff]   ;;  %v1558_v12 = vld [vmem:[#allocation8 + $0x68] sm:$0xff]  ;;  %v710_v63 = vlaneseq }
  0x65   : > { %1309 = vsyncadd (%p1692_p12), [#allocation9], 4294965248  ;;  %440 = vmatprep.mubr.bf16.mxu0 %v1346_v0  ;;  %408 = vmatprep.subr.bf16.mxu0 %v1102_v1  ;;  %v1539_v3 = vld [vmem:[#allocation7 + $0x64] ss:$8 sps:$4 sm:$0xff]   ;;  %v1542_v4 = vld [vmem:[#allocation7 + $0x60] ss:$8 sps:$4 sm:$0xff]  }
  0x66   : > { %409 = vmatpush1.bf16.msra.mxu0 %v1537_v2  ;;  %v1545_v5 = vld [vmem:[#allocation7 + $0x54] ss:$8 sps:$4 sm:$0xff]   ;;  %v1548_v6 = vld [vmem:[#allocation7 + $0x50] ss:$8 sps:$4 sm:$0xff]   ;;  %v1111_v7 = vld [vmem:[#allocation7 + $0x44] ss:$8 sps:$4 sm:$0xff]  }
  0x67   : > { %410 = vmatprep.subr.bf16.mxu0 %v1539_v3  ;;  %v1113_v8 = vld [vmem:[#allocation7 + $0x40] ss:$8 sps:$4 sm:$0xff]   ;;  %v1114_v9 = vld [vmem:[#allocation7 + $0x34] ss:$8 sps:$4 sm:$0xff]   ;;  %v1116_v13 = vld [vmem:[#allocation7 + $0x30] ss:$8 sps:$4 sm:$0xff]  }
  0x68   : > { %v1552_v10 = vld [vmem:[#allocation8 + $0x78] sm:$0xff]  ;;  %v1555_v11 = vld [vmem:[#allocation8 + $0x70] sm:$0xff]  ;;  %v1117_v14 = vld [vmem:[#allocation7 + $0x24] ss:$8 sps:$4 sm:$0xff]   ;;  %s898_s21 = sshll.u32 %s1328_s18, 4  ;;  %s297_s23 = scalar_lea.vmem [#allocation10], %s1511_s0 }
  0x69   : > { %939 = vmatprep.subr.mxu1 %v1552_v10  ;;  %v1562_v15 = vld [vmem:[#allocation8 + $0x60] sm:$0xff]  ;;  %v1566_v16 = vld [vmem:[#allocation8 + $0x58] sm:$0xff]  ;;  %v1570_v19 = vld [vmem:[#allocation8 + $0x50] sm:$0xff]  ;;  %s742_s30 = sshll.u32 %s297_s23, 4  ;;  %s740_s11 = scalar_lea.hbm %s1671_s4, %s898_s21  ;;  %s743_s30 = int_to_ptr.vmem [resolvable:$true] %s742_s30 }
  0x6a   : > { %411 = vmatpush1.bf16.msra.mxu0 %v1542_v4  ;;  %940 = vmatpush3.msra.mxu1 %v1552_v10  ;;  %v1119_v17 = vld [vmem:[#allocation7 + $0x20] ss:$8 sps:$4 sm:$0xff]   ;;  %v1120_v18 = vld [vmem:[#allocation7 + $0x14] ss:$8 sps:$4 sm:$0xff]   ;;  %v1122_v21 = vld [vmem:[#allocation7 + $0x10] ss:$8 sps:$4 sm:$0xff]  }
  0x6b   : > { %412 = vmatprep.subr.bf16.mxu0 %v1545_v5  ;;  %941 = vmatprep.subr.mxu1 %v1555_v11  ;;  %v1574_v20 = vld [vmem:[#allocation8 + $0x48] sm:$0xff]  ;;  %v1578_v23 = vld [vmem:[#allocation8 + $0x40] sm:$0xff]  ;;  %v1582_v24 = vld [vmem:[#allocation8 + $0x38] sm:$0xff]  ;;  %s729_s6 = scalar_lea.sflag [#allocation4], %s1511_s0  ;;  %s1244_s27 = scalar_lea.vmem %s743_s30, 16 }
  0x6c   : > { %942 = vmatpush3.msra.mxu1 %v1555_v11  ;;  %v1123_v22 = vld [vmem:[#allocation7 + $0x4] ss:$8 sps:$4 sm:$0xff]   ;;  %v1125_v25 = vld [vmem:[#allocation7] ss:$8 sps:$4 sm:$0xff]   ;;  %v1586_v26 = vld [vmem:[#allocation8 + $0x30] sm:$0xff]  ;;  %p1245_p4 = scmp.ne.s32.totalorder %s743_s30, %s1244_s27  ;;  %s1347_s8 = smov [#allocation10]  }
  0x6d   : > { %943 = vmatprep.subr.mxu1 %v1558_v12  ;;  %v1126_v27 = vld [vmem:[%s1515_s28] sm:$0xff]   ;;  %v1127_v29 = vld [vmem:[%s1522_s29] sm:$0xff]   ;;  %s1248_s14 = sshll.u32 %s1347_s8, 4  ;;  %s1249_s14 = int_to_ptr.vmem [resolvable:$false] %s1248_s14 }
  0x6e   : > { %413 = vmatpush1.bf16.msra.mxu0 %v1548_v6  ;;  %944 = vmatpush3.msra.mxu1 %v1558_v12  ;;  %v1591_v28 = vld [vmem:[#allocation8 + $0x28] sm:$0xff]  ;;  %v461_v30 = vld [vmem:[#allocation8 + $0x20] sm:$0xff]  ;;  %v460_v31 = vld [vmem:[#allocation8 + $0x18] sm:$0xff]  ;;  %p1246_p3 = pnand %p1245_p4, %p1464_p9  ;;  %s1250_s18 = scalar_lea.vmem %s1249_s14, 32 }
  0x6f   : > { %414 = vmatprep.subr.bf16.mxu0 %v1111_v7  ;;  %945 = vmatprep.subr.mxu1 %v1562_v15  ;;  %v459_v32 = vld [vmem:[#allocation8 + $0x10] sm:$0xff]  ;;  %v458_v33 = vld [vmem:[#allocation8 + $0x8] sm:$0xff]  ;;  %v457_v34 = vld [vmem:[#allocation8] sm:$0xff]  ;;  %p1251_p11 = scmp.lt.s32.totalorder %s743_s30, %s1249_s14  ;;  %p1252_p5 = scmp.lt.s32.totalorder %s1250_s18, %s1244_s27 }
  0x70   : > { %946 = vmatpush3.msra.mxu1 %v1562_v15  ;;  %p1247_p7 = pneg %p1246_p3 }
  0x71   : > { %947 = vmatprep.subr.mxu1 %v1566_v16  ;;  %p1253_p10 = por %p1252_p5, %p1251_p11 }
  0x72   : > { %415 = vmatpush1.bf16.msra.mxu0 %v1113_v8  ;;  %948 = vmatpush3.msra.mxu1 %v1566_v16 }
  0x73   : > { %416 = vmatprep.subr.bf16.mxu0 %v1114_v9  ;;  %949 = vmatprep.subr.mxu1 %v1570_v19  ;;  %p1254_p1 = pnand %p1253_p10, %p1247_p7 }
  0x74   : > { %950 = vmatpush3.msra.mxu1 %v1570_v19 }
  0x75   : > { %951 = vmatprep.subr.mxu1 %v1574_v20 }
  0x76   : > { %417 = vmatpush1.bf16.msra.mxu0 %v1116_v13  ;;  %952 = vmatpush3.msra.mxu1 %v1574_v20 }
  0x77   : > { %418 = vmatprep.subr.bf16.mxu0 %v1117_v14  ;;  %953 = vmatprep.subr.mxu1 %v1578_v23 }
  0x78   : > { %954 = vmatpush3.msra.mxu1 %v1578_v23 }
  0x79   : > { %955 = vmatprep.subr.mxu1 %v1582_v24 }
  0x7a   : > { %419 = vmatpush1.bf16.msra.mxu0 %v1119_v17  ;;  %956 = vmatpush3.msra.mxu1 %v1582_v24 }
  0x7b   : > { %420 = vmatprep.subr.bf16.mxu0 %v1120_v18  ;;  %957 = vmatprep.subr.mxu1 %v1586_v26 }
  0x7c   : > { %958 = vmatpush3.msra.mxu1 %v1586_v26 }
  0x7d   : > { %959 = vmatprep.subr.mxu1 %v1591_v28 }
  0x7e   : > { %421 = vmatpush1.bf16.msra.mxu0 %v1122_v21  ;;  %960 = vmatpush3.msra.mxu1 %v1591_v28 }
  0x7f   : > { %422 = vmatprep.subr.bf16.mxu0 %v1123_v22  ;;  %961 = vmatprep.subr.mxu1 %v461_v30 }
  0x80   : > { %962 = vmatpush3.msra.mxu1 %v461_v30 }
  0x81   : > { %963 = vmatprep.subr.mxu1 %v460_v31 }
  0x82   : > { %423 = vmatpush1.bf16.msra.mxu0 %v1125_v25  ;;  %964 = vmatpush3.msra.mxu1 %v460_v31 }
  0x83   : > { %562 = vmatprep.subr.bf16.mxu0 %v1102_v1  ;;  %965 = vmatprep.subr.mxu1 %v459_v32 }
  0x84   : > { %966 = vmatpush3.msra.mxu1 %v459_v32 }
  0x85   : > { %441 = vmatmul.mubr.bf16.vlgmr.msra.gmra.mxu0 %v1126_v27  ;;  %967 = vmatprep.subr.mxu1 %v458_v33 }
  0x86   : > { %563 = vmatpush1.bf16.msra.mxu0 %v1537_v2  ;;  %594 = vmatprep.mubr.bf16.mxu0 %v1346_v0  ;;  %v711_v0 = vshrl.u32 %v710_v63, 7 }
  0x87   : > { %564 = vmatprep.subr.bf16.mxu0 %v1539_v3  ;;  %968 = vmatpush3.msra.mxu1 %v458_v33 }
  0x88   : > { %969 = vmatprep.subr.mxu1 %v457_v34 }
  0x89   : > { %970 = vmatpush3.msra.mxu1 %v457_v34 }
  0x8a   : > { %565 = vmatpush1.bf16.msra.mxu0 %v1542_v4  ;;  %974 = vmatprep.subr.mxu1 %v1552_v10  ;;  %v712_v4 = vadd.s32 8, %v711_v0 }
  0x8b   : > { %566 = vmatprep.subr.bf16.mxu0 %v1545_v5 }
  0x8c   : > { %vm717_vm0 = vcmp.lt.s32.totalorder %v712_v4, 13 }
  0x8e   : > { %567 = vmatpush1.bf16.msra.mxu0 %v1548_v6 }
  0x8f   : > { %568 = vmatprep.subr.bf16.mxu0 %v1111_v7 }
  0x92   : > { %569 = vmatpush1.bf16.msra.mxu0 %v1113_v8 }
  0x93   : > { %570 = vmatprep.subr.bf16.mxu0 %v1114_v9 }
  0x96   : > { %571 = vmatpush1.bf16.msra.mxu0 %v1116_v13 }
  0x97   : > { %572 = vmatprep.subr.bf16.mxu0 %v1117_v14 }
  0x9a   : > { %573 = vmatpush1.bf16.msra.mxu0 %v1119_v17 }
  0x9b   : > { %574 = vmatprep.subr.bf16.mxu0 %v1120_v18 }
  0x9e   : > { %575 = vmatpush1.bf16.msra.mxu0 %v1122_v21 }
  0x9f   : > { %576 = vmatprep.subr.bf16.mxu0 %v1123_v22 }
  0xa2   : > { %577 = vmatpush1.bf16.msra.mxu0 %v1125_v25 }
  0xa5   : > { %595 = vmatmul.mubr.bf16.vlgmr.msra.gmra.mxu0 %v1127_v29 }
 0x145   : > { %v442_v35 = vpop.f32.mrf.mxu0 }
 0x146   : > { %v451_v36 = vmul.f32 %v442_v35, %v442_v35 }
 0x147   : > { %v444_v37 = vpop.f32.mrf.mxu0 }
 0x148   : > { %v453_v38 = vmul.f32 %v444_v37, %v444_v37 }
 0x149   : > { %v446_v39 = vpop.f32.mrf.mxu0 }
 0x14a   : > { %v455_v40 = vadd.f32 %v453_v38, %v451_v36  ;;  %v452_v42 = vmul.f32 %v446_v39, %v446_v39 }
 0x14b   : > { %v448_v41 = vpop.f32.mrf.mxu0 }
 0x14c   : > { %v454_v43 = vmul.f32 %v448_v41, %v448_v41  ;;  %971 = vmatprep.mubr.f32.mxu1 %v455_v40 }
 0x14e   : > { %v456_v44 = vadd.f32 %v454_v43, %v452_v42 }
 0x150   : > { %972 = vmatmul.mubr.f32.vlgmr.msra.gmra.mxu1 %v456_v44 }
 0x151   : > { %975 = vmatpush3.msra.mxu1 %v1552_v10 }
 0x152   : > { %976 = vmatprep.subr.mxu1 %v1555_v11 }
 0x153   : > { %977 = vmatpush3.msra.mxu1 %v1555_v11 }
 0x154   : > { %978 = vmatprep.subr.mxu1 %v1558_v12 }
 0x155   : > { %979 = vmatpush3.msra.mxu1 %v1558_v12 }
 0x156   : > { %980 = vmatprep.subr.mxu1 %v1562_v15 }
 0x157   : > { %981 = vmatpush3.msra.mxu1 %v1562_v15 }
 0x158   : > { %982 = vmatprep.subr.mxu1 %v1566_v16 }
 0x159   : > { %983 = vmatpush3.msra.mxu1 %v1566_v16 }
 0x15a   : > { %984 = vmatprep.subr.mxu1 %v1570_v19 }
 0x15b   : > { %985 = vmatpush3.msra.mxu1 %v1570_v19 }
 0x15c   : > { %986 = vmatprep.subr.mxu1 %v1574_v20 }
 0x15d   : > { %987 = vmatpush3.msra.mxu1 %v1574_v20 }
 0x15e   : > { %988 = vmatprep.subr.mxu1 %v1578_v23 }
 0x15f   : > { %989 = vmatpush3.msra.mxu1 %v1578_v23 }
 0x160   : > { %990 = vmatprep.subr.mxu1 %v1582_v24 }
 0x161   : > { %991 = vmatpush3.msra.mxu1 %v1582_v24 }
 0x162   : > { %992 = vmatprep.subr.mxu1 %v1586_v26 }
 0x163   : > { %993 = vmatpush3.msra.mxu1 %v1586_v26 }
 0x164   : > { %994 = vmatprep.subr.mxu1 %v1591_v28 }
 0x165   : > { %v596_v45 = vpop.f32.mrf.mxu0  ;;  %995 = vmatpush3.msra.mxu1 %v1591_v28 }
 0x166   : > { %996 = vmatprep.subr.mxu1 %v461_v30  ;;  %v605_v47 = vmul.f32 %v596_v45, %v596_v45 }
 0x167   : > { %v598_v46 = vpop.f32.mrf.mxu0  ;;  %997 = vmatpush3.msra.mxu1 %v461_v30 }
 0x168   : > { %v607_v48 = vmul.f32 %v598_v46, %v598_v46  ;;  %998 = vmatprep.subr.mxu1 %v460_v31 }
 0x169   : > { %v600_v49 = vpop.f32.mrf.mxu0  ;;  %999 = vmatpush3.msra.mxu1 %v460_v31 }
 0x16a   : > { %v609_v50 = vadd.f32 %v607_v48, %v605_v47  ;;  %1000 = vmatprep.subr.mxu1 %v459_v32  ;;  %v606_v52 = vmul.f32 %v600_v49, %v600_v49 }
 0x16b   : > { %v602_v51 = vpop.f32.mrf.mxu0  ;;  %1001 = vmatpush3.msra.mxu1 %v459_v32 }
 0x16c   : > { %v608_v53 = vmul.f32 %v602_v51, %v602_v51  ;;  %1002 = vmatprep.subr.mxu1 %v458_v33  ;;  %1006 = vmatprep.mubr.f32.mxu1 %v609_v50 }
 0x16d   : > { %1003 = vmatpush3.msra.mxu1 %v458_v33 }
 0x16e   : > { %v610_v54 = vadd.f32 %v608_v53, %v606_v52  ;;  %1004 = vmatprep.subr.mxu1 %v457_v34 }
 0x16f   : > { %1005 = vmatpush3.msra.mxu1 %v457_v34 }
 0x170   : > { %1007 = vmatmul.mubr.f32.vlgmr.msra.gmra.mxu1 %v610_v54 }
 0x210   : > { %v973_v55 = vpop.f32.mrf.mxu1 }
 0x211   : > { %v545_v57 = vadd.f32 1e-07, %v973_v55 }
 0x212   : > { %v539_v56 = vpop.f32.mrf.mxu1 }
 0x213   : > { %v540_v58 = vadd.f32 1e-07, %v539_v56  ;;  %1128 = vlog2.f32 %v545_v57 }
 0x215   : > { %1130 = vlog2.f32 %v540_v58 }
 0x220   : > { %v1129_v1 = vpop.eup %1128 }
 0x221   : > { %v551_v5 = vmul.f32 0.6931472, %v1129_v1 }
 0x222   : > { %v1131_v2 = vpop.eup %1130 }
 0x223   : > { %v549_v8 = vmul.f32 0.6931472, %v1131_v2 }
 0x230   : > { %v1008_v59 = vpop.f32.mrf.mxu1 }
 0x231   : > { %v683_v60 = vadd.f32 1e-07, %v1008_v59 }
 0x232   : > { %v677_v61 = vpop.f32.mrf.mxu1 }
 0x233   : > { %1132 = vlog2.f32 %v683_v60  ;;  %v678_v62 = vadd.f32 1e-07, %v677_v61 }
 0x235   : > { %1134 = vlog2.f32 %v678_v62 }
 0x240   : > { %v1133_v3 = vpop.eup %1132 }
 0x241   : > { %v689_v6 = vmul.f32 0.6931472, %v1133_v3 }
 0x242   : > { %v1135_v7 = vpop.eup %1134 }
 0x243   : > { %v691_v9 = vsub.f32 %v551_v5, %v689_v6  ;;  %v687_v10 = vmul.f32 0.6931472, %v1135_v7 }
 0x245   : > { %v693_v11 = vmul.f32 %v691_v9, %v691_v9  ;;  %v690_v12 = vsub.f32 %v549_v8, %v687_v10 }
 0x247   : > { %v719_v13 = vsel %vm717_vm0, %v693_v11, 0.0  ;;  %v692_v14 = vmul.f32 %v690_v12, %v690_v12 }
 0x249   : > { %v720_v15 = vadd.f32 %v719_v13, %v692_v14 }
 0x24b   : > { %v721_v16 = vrot.slane %v720_v15, 4 }
 0x24d   : > { %v722_v17 = vadd.f32 %v721_v16, %v720_v15 }
 0x24f   : > { %v723_v18 = vrot.slane %v722_v17, 2 }
 0x251   : > { %v724_v19 = vadd.f32 %v723_v18, %v722_v17 }
 0x253   : > { %v725_v20 = vrot.slane %v724_v19, 1 }
 0x255   : > { %v726_v21 = vadd.f32 %v725_v20, %v724_v19 }
 0x257   : > { %727 = vst [vmem:[%s297_s23] sm:$0x1] %v726_v21 }
 0x258   : > { %1257 = shalt.err (!%p1254_p1)
}
 0x259   : > { %s1258_s26 = scalar_lea.hbm %s740_s11, 16  ;;  %s1262_s7 = scalar_lea.hbm %s1671_s4, 32 }
 0x25a   : > { %p1259_p2 = scmp.ne.s32.totalorder %s740_s11, %s1258_s26  ;;  %p1263_p13 = scmp.lt.s32.totalorder %s740_s11, %s1671_s4 }
 0x25b   : > { %p1264_p0 = scmp.lt.s32.totalorder %s1262_s7, %s1258_s26 }
 0x25c   : > { %p1260_p6 = pnand %p1259_p2, %p1464_p9 }
 0x25d   : > { %p1265_p12 = por %p1264_p0, %p1263_p13 }
 0x25e   : > { %p1261_p8 = pneg %p1260_p6 }
 0x260   : > { %p1266_p4 = pnand %p1265_p12, %p1261_p8 }
 0x262   : > { %1269 = shalt.err (!%p1266_p4)
}
 0x263   : > { %1021 = dma.vmem_to_hbm [thread:$0]  (%p1464_p9), %s743_s30, 16, %s740_s11, %s729_s6  }
 0x264 PF: > { %s754_s13 = sand.u32 1, %s1316_s15   ;;  %p1693_p3 = scmp.ne.s32.totalorder %s1678_s24, 0 }
 0x265   : > { %p1694_p7 = scmp.ge.s32.totalorder %s1336_s20, 2  ;;  %s755_s28 = scalar_lea.sflag [#allocation4], %s754_s13 }
 0x267   : > { %p1038_p11 = pnand %p1694_p7, %p1693_p3 }
 0x269   : > { %p1039_p5 = pneg %p1038_p11 }
 0x26b   : > { %1311 = dma.done.wait (%p1039_p5), %s755_s28, 16  }
 0x26c   : > { %1313 = vsyncadd (%p1039_p5), %s755_s28, 4294967280  ;;  %s24_s20 = sadd.s32 1, %s1336_s20   ;;  %s1695_s3 = sld [smem:[#allocation17_spill]] }
 0x26d   : > { %p21_p10 = scmp.ge.s32.totalorder %s24_s20, 4   ;;  %s1696_s22 = sld [smem:[#allocation16_spill]] }
 0x26e   : > { %s1697_s15 = smov %s1320_s16  ;;  %s1698_s16 = smov %s1324_s17 }
 0x26f   : > { %s1700_s18 = smov %s1332_s19  ;;  %23 = sbr.rel (!%p21_p10) target bundleno = 13 (0xd), region = 112 }
 0x272   : > { %s1699_s17 = smov %s1695_s3 }
 0x273   : > { %s1701_s19 = smov %s1696_s22 }
 0x274   :  { %759 = vsyncpa [#allocation3], 1 }
 0x275   :  { %761 = vsyncpa [#allocation3 + $0x1], 1 }
 0x276   :  { %762 = vsyncpa [#allocation6], 1 }
 0x277   :  { %764 = vsyncpa [#allocation6 + $0x1], 1 }
 0x278   :  { %765 = vsyncpa [#allocation9], 1 }
 0x279   :  { %766 = vsyncpa [#allocation4], 1 }
 0x27a   :  { %768 = vsyncpa [#allocation4 + $0x1], 1 }

</bundles_post_ra>
